<compile_context>
chip_gen: v7x
topology: tpu7x:2x2x1
jax: 0.10.0
libtpu: 0.0.40
codegen_flags: <defaults>
</compile_context>

<pallas_src>
import functools

import jax
import jax.numpy as jnp
from jax.experimental import pallas as pl
from jax.experimental.pallas import tpu as pltpu

# Explicit VMEM budget (review item): safe on v5e/v6e (128 MiB) and v7x (64 MiB).
_VMEM_LIMIT_BYTES = 48 * 1024 * 1024


# --------------------------------------------------------------------------
# Kernel 1: per-head QKV projection (+ fused query scaling)
# --------------------------------------------------------------------------
def _qkv_proj_kernel(x_ref, wq_ref, wk_ref, wv_ref, bq_ref, bk_ref, bv_ref,
                     q_ref, k_ref, v_ref, *, scale):
    # x_ref: (1, S, E);  w*_ref: (1, E, D);  b*_ref: (1, 1, D)
    # outputs: (1, 1, S, D) blocks of (B, H, S, D)
    x = x_ref[0]                                                   # (S, E)

    q = jnp.dot(x, wq_ref[0], preferred_element_type=jnp.float32) + bq_ref[0]
    k = jnp.dot(x, wk_ref[0], preferred_element_type=jnp.float32) + bk_ref[0]
    v = jnp.dot(x, wv_ref[0], preferred_element_type=jnp.float32) + bv_ref[0]

    # Fold softmax scale into Q here: (S, D) mults instead of (S, S) later.
    q_ref[0, 0] = (q * jnp.float32(scale)).astype(q_ref.dtype)
    k_ref[0, 0] = k.astype(k_ref.dtype)
    v_ref[0, 0] = v.astype(v_ref.dtype)


# --------------------------------------------------------------------------
# Kernel 2: flash attention (online softmax over KV tiles)
# --------------------------------------------------------------------------
def _flash_attn_kernel(q_ref, k_ref, v_ref, o_ref, m_sc, l_sc, acc_sc):
    ki = pl.program_id(3)

    @pl.when(ki == 0)
    def _():
        m_sc[...] = jnp.full_like(m_sc, -jnp.inf)
        l_sc[...] = jnp.zeros_like(l_sc)
        acc_sc[...] = jnp.zeros_like(acc_sc)

    q = q_ref[0, 0]                                                # (tq,  D), pre-scaled
    k = k_ref[0, 0]                                                # (tkv, D)
    v = v_ref[0, 0]                                                # (tkv, D)

    # scores = q @ k^T without materializing a transpose: contract last dims.
    s = jax.lax.dot_general(q, k, (((1,), (1,)), ((), ())),
                            preferred_element_type=jnp.float32)    # (tq, tkv)

    m_prev = m_sc[...]
    m_new = jnp.maximum(m_prev, jnp.max(s, axis=-1, keepdims=True))
    alpha = jnp.exp(m_prev - m_new)
    p = jnp.exp(s - m_new)

    l_sc[...] = alpha * l_sc[...] + jnp.sum(p, axis=-1, keepdims=True)
    acc_sc[...] = alpha * acc_sc[...] + jnp.dot(
        p.astype(v.dtype), v, preferred_element_type=jnp.float32)
    m_sc[...] = m_new

    @pl.when(ki == pl.num_programs(3) - 1)
    def _():
        inv_l = pl.reciprocal(l_sc[...], approx=True)              # EUP slot
        o_ref[0, 0] = (acc_sc[...] * inv_l).astype(o_ref.dtype)


# --------------------------------------------------------------------------
# Kernel 3: output projection, reducing over heads (replaces concat + matmul)
# --------------------------------------------------------------------------
def _out_proj_kernel(attn_ref, w_ref, b_ref, o_ref, acc_ref):
    h = pl.program_id(2)

    @pl.when(h == 0)
    def _():
        acc_ref[...] = jnp.zeros_like(acc_ref) + b_ref[...].astype(jnp.float32)

    acc_ref[...] += jnp.dot(attn_ref[0, 0], w_ref[0],
                            preferred_element_type=jnp.float32)

    @pl.when(h == pl.num_programs(2) - 1)
    def _():
        o_ref[0] = acc_ref[...].astype(o_ref.dtype)


# --------------------------------------------------------------------------
# Wrapper
# --------------------------------------------------------------------------
def multi_head_attention(x, wqkv, bqkv, wproj, bproj, *, num_heads):
    """x: (B, S, E). wqkv: (3E, E) torch layout, bqkv: (3E,),
    wproj: (E, E) torch layout, bproj: (E,)."""
    B, S, E = x.shape
    H = num_heads
    assert E % H == 0, "embedding_dim must be divisible by num_heads"
    D = E // H
    dtype = x.dtype

    # Attention tile sizes (query / key-value).
    tq = min(S, 128)
    tkv = min(S, 128)
    # TODO(synk): pad/mask ragged sequence lengths instead of asserting.
    assert S % tq == 0 and S % tkv == 0
    n_q, n_kv = S // tq, S // tkv

    # --- one-time, wrapper-side weight layout plumbing (torch W.T, per head) ---
    w_t = wqkv.T.reshape(E, 3, H, D)                  # (E, 3, H, D)
    w_t = jnp.transpose(w_t, (1, 2, 0, 3))            # (3, H, E, D)
    wq_h, wk_h, wv_h = w_t[0], w_t[1], w_t[2]         # each (H, E, D)
    b_h = bqkv.reshape(3, H, 1, D)
    bq_h, bk_h, bv_h = b_h[0], b_h[1], b_h[2]         # each (H, 1, D)
    wproj_h = wproj.T.reshape(H, D, E)                # (H, D, E)
    bproj2 = bproj.reshape(1, E)

    # ---------------- kernel 1: QKV projection ----------------
    qkv_kernel = functools.partial(_qkv_proj_kernel, scale=float(D) ** -0.5)
    head_spec = pl.BlockSpec((1, E, D), lambda b, h: (h, 0, 0))
    bias_spec = pl.BlockSpec((1, 1, D), lambda b, h: (h, 0, 0))
    qkv_out_spec = pl.BlockSpec((1, 1, S, D), lambda b, h: (b, h, 0, 0))

    q, k, v = pl.pallas_call(
        qkv_kernel,
        out_shape=(jax.ShapeDtypeStruct((B, H, S, D), dtype),
                   jax.ShapeDtypeStruct((B, H, S, D), dtype),
                   jax.ShapeDtypeStruct((B, H, S, D), dtype)),
        grid_spec=pltpu.PrefetchScalarGridSpec(
            num_scalar_prefetch=0,
            grid=(B, H),
            in_specs=[
                pl.BlockSpec((1, S, E), lambda b, h: (b, 0, 0)),   # x
                head_spec, head_spec, head_spec,                    # Wq/Wk/Wv panels
                bias_spec, bias_spec, bias_spec,                    # biases
            ],
            out_specs=(qkv_out_spec, qkv_out_spec, qkv_out_spec),
        ),
        compiler_params=pltpu.CompilerParams(
            dimension_semantics=("parallel", "parallel"),
            vmem_limit_bytes=_VMEM_LIMIT_BYTES),
    )(x, wq_h, wk_h, wv_h, bq_h, bk_h, bv_h)

    # ---------------- kernel 2: flash attention ----------------
    attn = pl.pallas_call(
        _flash_attn_kernel,
        out_shape=jax.ShapeDtypeStruct((B, H, S, D), dtype),
        grid_spec=pltpu.PrefetchScalarGridSpec(
            num_scalar_prefetch=0,
            grid=(B, H, n_q, n_kv),
            in_specs=[
                pl.BlockSpec((1, 1, tq, D), lambda b, h, qi, ki: (b, h, qi, 0)),
                pl.BlockSpec((1, 1, tkv, D), lambda b, h, qi, ki: (b, h, ki, 0)),
                pl.BlockSpec((1, 1, tkv, D), lambda b, h, qi, ki: (b, h, ki, 0)),
            ],
            out_specs=pl.BlockSpec((1, 1, tq, D),
                                   lambda b, h, qi, ki: (b, h, qi, 0)),
            scratch_shapes=[
                pltpu.VMEM((tq, 1), jnp.float32),   # running max m
                pltpu.VMEM((tq, 1), jnp.float32),   # running sum l
                pltpu.VMEM((tq, D), jnp.float32),   # output accumulator
            ],
        ),
        compiler_params=pltpu.CompilerParams(
            dimension_semantics=("parallel", "parallel", "parallel", "arbitrary"),
            vmem_limit_bytes=_VMEM_LIMIT_BYTES),
    )(q, k, v)

    # ---------------- kernel 3: output projection (reduce over heads) --------
    out = pl.pallas_call(
        _out_proj_kernel,
        out_shape=jax.ShapeDtypeStruct((B, S, E), dtype),
        grid_spec=pltpu.PrefetchScalarGridSpec(
            num_scalar_prefetch=0,
            grid=(B, n_q, H),
            in_specs=[
                pl.BlockSpec((1, 1, tq, D), lambda b, qi, h: (b, h, qi, 0)),
                pl.BlockSpec((1, D, E), lambda b, qi, h: (h, 0, 0)),
                pl.BlockSpec((1, E), lambda b, qi, h: (0, 0)),
            ],
            out_specs=pl.BlockSpec((1, tq, E), lambda b, qi, h: (b, qi, 0)),
            scratch_shapes=[pltpu.VMEM((tq, E), jnp.float32)],
        ),
        compiler_params=pltpu.CompilerParams(
            dimension_semantics=("parallel", "parallel", "arbitrary"),
            vmem_limit_bytes=_VMEM_LIMIT_BYTES),
    )(attn, wproj_h, bproj2)

    return out


# --------------------------------------------------------------------------
# Pure-JAX reference (mirrors the PyTorch forward) for verification
# --------------------------------------------------------------------------
def _reference(x, wqkv, bqkv, wproj, bproj, num_heads):
    B, S, E = x.shape
    D = E // num_heads
    qkv = x @ wqkv.T + bqkv                                # (B, S, 3E)
    qkv = qkv.reshape(B, S, 3, num_heads, D)
    qkv = jnp.transpose(qkv, (2, 0, 3, 1, 4))              # (3, B, H, S, D)
    q, k, v = qkv[0], qkv[1], qkv[2]
    scores = jnp.einsum("bhqd,bhkd->bhqk", q, k) * (D ** -0.5)
    p = jax.nn.softmax(scores, axis=-1)
    attn = jnp.einsum("bhqk,bhkd->bhqd", p, v)             # (B, H, S, D)
    attn = jnp.transpose(attn, (0, 2, 1, 3)).reshape(B, S, E)
    return attn @ wproj.T + bproj


if __name__ == "__main__":
    B, S, E, H = 2, 8, 32, 4

    key = jax.random.PRNGKey(0)
    k1, k2, k3, k4, k5 = jax.random.split(key, 5)
    x = jax.random.normal(k1, (B, S, E), dtype=jnp.float32)
    # torch.nn.Linear weight layout: (out_features, in_features)
    wqkv = jax.random.normal(k2, (3 * E, E), dtype=jnp.float32) * 0.1
    bqkv = jax.random.normal(k3, (3 * E,), dtype=jnp.float32) * 0.1
    wproj = jax.random.normal(k4, (E, E), dtype=jnp.float32) * 0.1
    bproj = jax.random.normal(k5, (E,), dtype=jnp.float32) * 0.1

    out = multi_head_attention(x, wqkv, bqkv, wproj, bproj, num_heads=H)
    out = jax.block_until_ready(out)

    ref = _reference(x, wqkv, bqkv, wproj, bproj, H)
    assert out.shape == (B, S, E)
    # tolerance accounts for the approx EUP reciprocal in the softmax normalize
    assert jnp.allclose(out, ref, atol=2e-3, rtol=2e-3), "mismatch vs reference"

    print("KERNEL_OK")
</pallas_src>

<mosaic_0001>
module attributes {stable_mosaic.version = 11 : i64} {
  func.func @_qkv_proj_kernel(%arg0: i32, %arg1: i32, %arg2: memref<1x8x32xf32, #tpu.memory_space<vmem>>, %arg3: memref<1x32x8xf32, #tpu.memory_space<vmem>>, %arg4: memref<1x32x8xf32, #tpu.memory_space<vmem>>, %arg5: memref<1x32x8xf32, #tpu.memory_space<vmem>>, %arg6: memref<1x1x8xf32, #tpu.memory_space<vmem>>, %arg7: memref<1x1x8xf32, #tpu.memory_space<vmem>>, %arg8: memref<1x1x8xf32, #tpu.memory_space<vmem>>, %arg9: memref<1x1x8x8xf32, #tpu.memory_space<vmem>>, %arg10: memref<1x1x8x8xf32, #tpu.memory_space<vmem>>, %arg11: memref<1x1x8x8xf32, #tpu.memory_space<vmem>>) attributes {dimension_semantics = [#tpu.dimension_semantics<parallel>, #tpu.dimension_semantics<parallel>], iteration_bounds = array<i64: 2, 4>, scalar_prefetch = 0 : i64, scratch_operands = 0 : i64, tpu.core_type = #tpu.core_type<tc>, window_params = [{transform_indices = @transform_0, window_bounds = array<i64: 1, 8, 32>}, {transform_indices = @transform_1, window_bounds = array<i64: 1, 32, 8>}, {transform_indices = @transform_2, window_bounds = array<i64: 1, 32, 8>}, {transform_indices = @transform_3, window_bounds = array<i64: 1, 32, 8>}, {transform_indices = @transform_4, window_bounds = array<i64: 1, 1, 8>}, {transform_indices = @transform_5, window_bounds = array<i64: 1, 1, 8>}, {transform_indices = @transform_6, window_bounds = array<i64: 1, 1, 8>}, {transform_indices = @transform_7, window_bounds = array<i64: 1, 1, 8, 8>}, {transform_indices = @transform_8, window_bounds = array<i64: 1, 1, 8, 8>}, {transform_indices = @transform_9, window_bounds = array<i64: 1, 1, 8, 8>}]} {
    %c0 = arith.constant 0 : index
    %c0_0 = arith.constant 0 : index
    %c0_1 = arith.constant 0 : index
    %0 = vector.load %arg2[%c0, %c0_0, %c0_1] : memref<1x8x32xf32, #tpu.memory_space<vmem>>, vector<1x8x32xf32>
    %1 = vector.shape_cast %0 : vector<1x8x32xf32> to vector<8x32xf32>
    %c0_2 = arith.constant 0 : index
    %c0_3 = arith.constant 0 : index
    %c0_4 = arith.constant 0 : index
    %2 = vector.load %arg3[%c0_2, %c0_3, %c0_4] : memref<1x32x8xf32, #tpu.memory_space<vmem>>, vector<1x32x8xf32>
    %3 = vector.shape_cast %2 : vector<1x32x8xf32> to vector<32x8xf32>
    %cst = arith.constant dense<0.000000e+00> : vector<8x8xf32>
    %4 = tpu.matmul %1, %3, %cst {dimension_numbers = #tpu.dot_dimension_numbers<[1], [0], [0], [1], [0, 0, 1, 1], [], []>} : vector<8x32xf32>, vector<32x8xf32>, vector<8x8xf32> -> vector<8x8xf32>
    %c0_5 = arith.constant 0 : index
    %c0_6 = arith.constant 0 : index
    %c0_7 = arith.constant 0 : index
    %5 = vector.load %arg6[%c0_5, %c0_6, %c0_7] : memref<1x1x8xf32, #tpu.memory_space<vmem>>, vector<1x1x8xf32>
    %6 = vector.shape_cast %5 : vector<1x1x8xf32> to vector<1x8xf32>
    %7 = vector.broadcast %6 : vector<1x8xf32> to vector<8x8xf32>
    %8 = arith.addf %4, %7 : vector<8x8xf32>
    %c0_8 = arith.constant 0 : index
    %c0_9 = arith.constant 0 : index
    %c0_10 = arith.constant 0 : index
    %9 = vector.load %arg4[%c0_8, %c0_9, %c0_10] : memref<1x32x8xf32, #tpu.memory_space<vmem>>, vector<1x32x8xf32>
    %10 = vector.shape_cast %9 : vector<1x32x8xf32> to vector<32x8xf32>
    %cst_11 = arith.constant dense<0.000000e+00> : vector<8x8xf32>
    %11 = tpu.matmul %1, %10, %cst_11 {dimension_numbers = #tpu.dot_dimension_numbers<[1], [0], [0], [1], [0, 0, 1, 1], [], []>} : vector<8x32xf32>, vector<32x8xf32>, vector<8x8xf32> -> vector<8x8xf32>
    %c0_12 = arith.constant 0 : index
    %c0_13 = arith.constant 0 : index
    %c0_14 = arith.constant 0 : index
    %12 = vector.load %arg7[%c0_12, %c0_13, %c0_14] : memref<1x1x8xf32, #tpu.memory_space<vmem>>, vector<1x1x8xf32>
    %13 = vector.shape_cast %12 : vector<1x1x8xf32> to vector<1x8xf32>
    %14 = vector.broadcast %13 : vector<1x8xf32> to vector<8x8xf32>
    %15 = arith.addf %11, %14 : vector<8x8xf32>
    %c0_15 = arith.constant 0 : index
    %c0_16 = arith.constant 0 : index
    %c0_17 = arith.constant 0 : index
    %16 = vector.load %arg5[%c0_15, %c0_16, %c0_17] : memref<1x32x8xf32, #tpu.memory_space<vmem>>, vector<1x32x8xf32>
    %17 = vector.shape_cast %16 : vector<1x32x8xf32> to vector<32x8xf32>
    %cst_18 = arith.constant dense<0.000000e+00> : vector<8x8xf32>
    %18 = tpu.matmul %1, %17, %cst_18 {dimension_numbers = #tpu.dot_dimension_numbers<[1], [0], [0], [1], [0, 0, 1, 1], [], []>} : vector<8x32xf32>, vector<32x8xf32>, vector<8x8xf32> -> vector<8x8xf32>
    %c0_19 = arith.constant 0 : index
    %c0_20 = arith.constant 0 : index
    %c0_21 = arith.constant 0 : index
    %19 = vector.load %arg8[%c0_19, %c0_20, %c0_21] : memref<1x1x8xf32, #tpu.memory_space<vmem>>, vector<1x1x8xf32>
    %20 = vector.shape_cast %19 : vector<1x1x8xf32> to vector<1x8xf32>
    %21 = vector.broadcast %20 : vector<1x8xf32> to vector<8x8xf32>
    %22 = arith.addf %18, %21 : vector<8x8xf32>
    %cst_22 = arith.constant 0.353553385 : f32
    %23 = vector.broadcast %cst_22 : f32 to vector<8x8xf32>
    %24 = arith.mulf %8, %23 : vector<8x8xf32>
    %c0_23 = arith.constant 0 : index
    %c0_24 = arith.constant 0 : index
    %c0_25 = arith.constant 0 : index
    %c0_26 = arith.constant 0 : index
    %25 = vector.load %arg9[%c0_23, %c0_24, %c0_25, %c0_26] : memref<1x1x8x8xf32, #tpu.memory_space<vmem>>, vector<1x1x8x8xf32>
    %26 = vector.shape_cast %25 : vector<1x1x8x8xf32> to vector<8x8xf32>
    %27 = vector.shape_cast %24 : vector<8x8xf32> to vector<1x1x8x8xf32>
    tpu.vector_store %arg9[%c0_23, %c0_24, %c0_25, %c0_26], %27 {strides = array<i32>} : memref<1x1x8x8xf32, #tpu.memory_space<vmem>>, vector<1x1x8x8xf32>,
    %c0_27 = arith.constant 0 : index
    %c0_28 = arith.constant 0 : index
    %c0_29 = arith.constant 0 : index
    %c0_30 = arith.constant 0 : index
    %28 = vector.load %arg10[%c0_27, %c0_28, %c0_29, %c0_30] : memref<1x1x8x8xf32, #tpu.memory_space<vmem>>, vector<1x1x8x8xf32>
    %29 = vector.shape_cast %28 : vector<1x1x8x8xf32> to vector<8x8xf32>
    %30 = vector.shape_cast %15 : vector<8x8xf32> to vector<1x1x8x8xf32>
    tpu.vector_store %arg10[%c0_27, %c0_28, %c0_29, %c0_30], %30 {strides = array<i32>} : memref<1x1x8x8xf32, #tpu.memory_space<vmem>>, vector<1x1x8x8xf32>,
    %c0_31 = arith.constant 0 : index
    %c0_32 = arith.constant 0 : index
    %c0_33 = arith.constant 0 : index
    %c0_34 = arith.constant 0 : index
    %31 = vector.load %arg11[%c0_31, %c0_32, %c0_33, %c0_34] : memref<1x1x8x8xf32, #tpu.memory_space<vmem>>, vector<1x1x8x8xf32>
    %32 = vector.shape_cast %31 : vector<1x1x8x8xf32> to vector<8x8xf32>
    %33 = vector.shape_cast %22 : vector<8x8xf32> to vector<1x1x8x8xf32>
    tpu.vector_store %arg11[%c0_31, %c0_32, %c0_33, %c0_34], %33 {strides = array<i32>} : memref<1x1x8x8xf32, #tpu.memory_space<vmem>>, vector<1x1x8x8xf32>,
    return
  }
  func.func @transform_0(%arg0: i32, %arg1: i32) -> (i32, i32, i32) {
    %c0_i32 = arith.constant 0 : i32
    %c0_i32_0 = arith.constant 0 : i32
    %c0_i32_1 = arith.constant 0 : i32
    return %arg0, %c0_i32, %c0_i32_0 : i32, i32, i32
  }
  func.func @transform_1(%arg0: i32, %arg1: i32) -> (i32, i32, i32) {
    %c0_i32 = arith.constant 0 : i32
    %c0_i32_0 = arith.constant 0 : i32
    %c0_i32_1 = arith.constant 0 : i32
    return %arg1, %c0_i32, %c0_i32_0 : i32, i32, i32
  }
  func.func @transform_2(%arg0: i32, %arg1: i32) -> (i32, i32, i32) {
    %c0_i32 = arith.constant 0 : i32
    %c0_i32_0 = arith.constant 0 : i32
    %c0_i32_1 = arith.constant 0 : i32
    return %arg1, %c0_i32, %c0_i32_0 : i32, i32, i32
  }
  func.func @transform_3(%arg0: i32, %arg1: i32) -> (i32, i32, i32) {
    %c0_i32 = arith.constant 0 : i32
    %c0_i32_0 = arith.constant 0 : i32
    %c0_i32_1 = arith.constant 0 : i32
    return %arg1, %c0_i32, %c0_i32_0 : i32, i32, i32
  }
  func.func @transform_4(%arg0: i32, %arg1: i32) -> (i32, i32, i32) {
    %c0_i32 = arith.constant 0 : i32
    %c0_i32_0 = arith.constant 0 : i32
    %c0_i32_1 = arith.constant 0 : i32
    return %arg1, %c0_i32, %c0_i32_0 : i32, i32, i32
  }
  func.func @transform_5(%arg0: i32, %arg1: i32) -> (i32, i32, i32) {
    %c0_i32 = arith.constant 0 : i32
    %c0_i32_0 = arith.constant 0 : i32
    %c0_i32_1 = arith.constant 0 : i32
    return %arg1, %c0_i32, %c0_i32_0 : i32, i32, i32
  }
  func.func @transform_6(%arg0: i32, %arg1: i32) -> (i32, i32, i32) {
    %c0_i32 = arith.constant 0 : i32
    %c0_i32_0 = arith.constant 0 : i32
    %c0_i32_1 = arith.constant 0 : i32
    return %arg1, %c0_i32, %c0_i32_0 : i32, i32, i32
  }
  func.func @transform_7(%arg0: i32, %arg1: i32) -> (i32, i32, i32, i32) {
    %c0_i32 = arith.constant 0 : i32
    %c0_i32_0 = arith.constant 0 : i32
    %c0_i32_1 = arith.constant 0 : i32
    return %arg0, %arg1, %c0_i32, %c0_i32_0 : i32, i32, i32, i32
  }
  func.func @transform_8(%arg0: i32, %arg1: i32) -> (i32, i32, i32, i32) {
    %c0_i32 = arith.constant 0 : i32
    %c0_i32_0 = arith.constant 0 : i32
    %c0_i32_1 = arith.constant 0 : i32
    return %arg0, %arg1, %c0_i32, %c0_i32_0 : i32, i32, i32, i32
  }
  func.func @transform_9(%arg0: i32, %arg1: i32) -> (i32, i32, i32, i32) {
    %c0_i32 = arith.constant 0 : i32
    %c0_i32_0 = arith.constant 0 : i32
    %c0_i32_1 = arith.constant 0 : i32
    return %arg0, %arg1, %c0_i32, %c0_i32_0 : i32, i32, i32, i32
  }
}

</mosaic_0001>

<bundles_post_ra>
// kernel: tpu_custom_call.1
= control target key start
LH: loop header
LB: loop body
LE: loop exit
PB: predicated region body
PF: predicated region fallthrough
CT: control target
= control target key end

     0   :  { %s1634_s0 = inlined_call_operand.vmem [shape: f32[2,8,32], index: 0, kind: input, shape index: {}]   ;;  %s1635_s1 = inlined_call_operand.vmem [shape: f32[4,32,8], index: 1, kind: input, shape index: {}]   ;;  %s1636_s2 = inlined_call_operand.vmem [shape: f32[4,32,8], index: 2, kind: input, shape index: {}]   ;;  %s1637_s3 = inlined_call_operand.vmem [shape: f32[4,32,8], index: 3, kind: input, shape index: {}]   ;;  %s1638_s4 = inlined_call_operand.vmem [shape: f32[4,1,8], index: 4, kind: input, shape index: {}]   ;;  %s1639_s5 = inlined_call_operand.vmem [shape: f32[4,1,8], index: 5, kind: input, shape index: {}]   ;;  %s1640_s6 = inlined_call_operand.vmem [shape: f32[4,1,8], index: 6, kind: input, shape index: {}]   ;;  %s1641_s7 = inlined_call_operand.hbm [shape: f32[2,4,8,8], index: 7, kind: output, shape index: {0}]   ;;  %s1642_s8 = inlined_call_operand.hbm [shape: f32[2,4,8,8], index: 8, kind: output, shape index: {1}]   ;;  %s1643_s9 = inlined_call_operand.hbm [shape: f32[2,4,8,8], index: 9, kind: output, shape index: {2}]  }
   0x1   :  { %1653 = sst [smem:[#allocation14_spill]] %s1634_s0 }
   0x2   :  { %1654 = sst [smem:[#allocation15_spill]] %s1635_s1 }
   0x3   :  { %1655 = sst [smem:[#allocation16_spill]] %s1636_s2 }
   0x4   :  { %1656 = sst [smem:[#allocation17_spill]] %s1637_s3 }
   0x5   :  { %1657 = sst [smem:[#allocation18_spill]] %s1638_s4 }
   0x6   :  { %15 = vsyncpa [#allocation3], 0 }
   0x7   :  { %17 = vsyncpa [#allocation3 + $0x1], 0 }
   0x8   :  { %18 = vsyncpa [#allocation5], 0 }
   0x9   :  { %20 = vsyncpa [#allocation5 + $0x1], 0  ;;  %s1372_s30 = smov 0   ;;  %s1374_s10 = smov 0  }
   0xa   :  { %s1376_s11 = smov 0   ;;  %s1378_s12 = smov 0  }
   0xb   :  { %s1380_s13 = smov 0   ;;  %s1382_s14 = smov 0  }
   0xc   :  { %s1384_s15 = smov 0   ;;  %s1386_s16 = smov 0  }
   0xd LB: > { %1658 = sst [smem:[#allocation9_spill]] %s1306_s14  ;;  %s1645_s17 = sadd.s32 4294967295, %s1314_s16   ;;  %s1314_s16 = sphi %s1386_s16, %s26_s16   ;;  %s1310_s15 = sphi %s1384_s15, %s1682_s15   ;;  %s1306_s14 = sphi %s1382_s14, %s1681_s14   ;;  %s1302_s13 = sphi %s1380_s13, %s1680_s13   ;;  %s1298_s12 = sphi %s1378_s12, %s1679_s12   ;;  %s1294_s11 = sphi %s1376_s11, %s1685_s11   ;;  %s1290_s10 = sphi %s1374_s10, %s1684_s10   ;;  %s1286_s30 = sphi %s1372_s30, %s1683_s30  }
   0xe   : > { %1659 = sst [smem:[#allocation10_spill]] %s1310_s15  ;;  %s1644_s18 = sadd.s32 4294967294, %s1314_s16  }
   0xf   : > { %s35_s19 = sadd.s32 1, %s1306_s14  ;;  %s38_s20 = sadd.s32 1, %s1310_s15 }
  0x10   : > { %p36_p0 = scmp.ge.s32.totalorder %s35_s19, 4  ;;  %p239_p1 = scmp.ne.s32.totalorder %s1294_s11, %s1290_s10 }
  0x11   : > { %p240_p2 = scmp.eq.s32.totalorder %s1645_s17, 7  ;;  %p245_p5 = scmp.ne.s32.totalorder %s1290_s10, %s1286_s30 }
  0x12   : > { %s1687_s19 = smov (%p36_p0, %s35_s19), 0  ;;  %s1689_s20 = smov (!%p36_p0, %s38_s20), %s1310_s15 }
  0x13   : > { %1660 = sst [smem:[#allocation11_spill]] %s1687_s19  ;;  %s225_s21 = ssub.s32 %s1306_s14, %s1687_s19 }
  0x14   : > { %p1425_p3 = por %p240_p2, %p239_p1  ;;  %p40_p4 = scmp.ge.s32.totalorder %s1689_s20, 2 }
  0x15   : > { %p246_p6 = scmp.eq.s32.totalorder %s1644_s18, 7  ;;  %p979_p7 = scmp.ge.s32.totalorder %s1314_s16, 1 }
  0x16   : > { %s1691_s20 = smov (%p40_p4, %s1689_s20), 0  ;;  %p369_p9 = scmp.lt.s32.totalorder %s1314_s16, 9 }
  0x17   : > { %1662 = sst [smem:[#allocation12_spill]] %s1691_s20  ;;  %p1436_p8 = por %p246_p6, %p245_p5 }
  0x18   : > { %s224_s24 = ssub.s32 %s1310_s15, %s1691_s20  ;;  %s229_s25 = sadd.s32 1, %s1294_s11 }
  0x19   : > { %s226_s26 = sor.u32 %s225_s21, %s224_s24  ;;  %p370_p10 = pnand %p979_p7, %p369_p9 }
  0x1a   : > { %p227_p11 = scmp.eq.s32.totalorder %s226_s26, 0  ;;  %p442_p12 = scmp.lt.s32.totalorder (!%p370_p10), %s1298_s12, 3  ;;  %v1316_v0 = vmov (!%p370_p10), 0.0|0.0   ;;  %vm1317_vm0 = vmmov (!%p370_p10), 0   ;;  %v1318_v1 = vmov (!%p370_p10), 0.0   ;;  %vm478_vm1 = vcmask (!%p370_p10), 261120  }
  0x1b   : > { %373 = sbr.rel (%p370_p10) target bundleno = 326 (0x146), region = 48  ;;  %p438_p13 = scmp.lt.s32.totalorder (!%p370_p10), %s1302_s13, 1  ;;  %1058 = vmatprep.subr.bf16.mxu0 (!%p370_p10), %v1316_v0  ;;  %1064 = vmatprep.subr.bf16.mxu1 (!%p370_p10), %v1316_v0  ;;  %vm715_vm2 = vcmask (!%p370_p10), 64512  }
  0x1c   : > { %s1445_s27 = scalar_select %p227_p11, %s1294_s11, %s229_s25  }
  0x1d   : > { %1033 = vmatprep.mubr.msk.f32.mxu0 (!%p370_p10), %vm1317_vm0, %v1318_v1  ;;  %1044 = vmatprep.mubr.msk.f32.mxu1 (!%p370_p10), %vm1317_vm0, %v1318_v1  ;;  %s1665_s1 = sld [smem:[#allocation15_spill]] (!%p370_p10)  ;;  %s1666_s2 = sld [smem:[#allocation16_spill]] (!%p370_p10) }
  0x1e   : > { %1664 = sst [smem:[#allocation13_spill]] %s1445_s27  ;;  %s1667_s3 = sld [smem:[#allocation17_spill]] (!%p370_p10) }
  0x1f   : > { %s1668_s0 = sld [smem:[#allocation14_spill]] (!%p370_p10)  ;;  %s1650_s15 = sand.u32 (!%p370_p10), 1, %s1290_s10  }
  0x20   : > { %s999_s18 = sshll.u32 (!%p370_p10), %s1302_s13, 2  ;;  %s1669_s4 = sld [smem:[#allocation18_spill]] (!%p370_p10) }
  0x22   : > { %s1450_s28 = scalar_select %p442_p12, %s1298_s12, 3 }
  0x23   : > { %s439_s29 = scalar_select %p438_p13, %s1302_s13, 1 }
  0x24   : > { %s1007_s21 = sshll.u32 %s1450_s28, 5  ;;  %s462_s24 = scalar_lea.vmem %s1639_s5, %s1450_s28 }
  0x25   : > { %s446_s26 = scalar_lea.vmem %s1665_s1, %s1007_s21  ;;  %s451_s20 = scalar_lea.vmem %s1666_s2, %s1007_s21  ;;  %v992_v22 = vld [vmem:[%s462_s24] ss:$0 sm:$0xff] }
  0x26   : > { %v467_v2 = vld [vmem:[%s446_s26] sm:$0xff]  ;;  %v468_v3 = vld [vmem:[%s446_s26 + $0x8] sm:$0xff]  ;;  %v469_v4 = vld [vmem:[%s446_s26 + $0x10] sm:$0xff]  ;;  %s456_s14 = scalar_lea.vmem %s1667_s3, %s1007_s21  ;;  %s983_s27 = sshll.u32 %s439_s29, 3 }
  0x27   : > { %v1059_v5 = vpack.c.bf16 %v468_v3, %v467_v2  ;;  %v470_v6 = vld [vmem:[%s446_s26 + $0x18] sm:$0xff]  ;;  %v552_v7 = vld [vmem:[%s451_s20] sm:$0xff]  ;;  %v553_v8 = vld [vmem:[%s451_s20 + $0x8] sm:$0xff]  ;;  %s441_s17 = scalar_lea.vmem %s1668_s0, %s983_s27  ;;  %s459_s27 = scalar_lea.vmem %s1669_s4, %s1450_s28 }
  0x28   : > { %v1065_v9 = vpack.c.bf16 %v553_v8, %v552_v7  ;;  %v1062_v10 = vpack.c.bf16 %v470_v6, %v469_v4  ;;  %v554_v11 = vld [vmem:[%s451_s20 + $0x10] sm:$0xff]  ;;  %v555_v12 = vld [vmem:[%s451_s20 + $0x18] sm:$0xff]  ;;  %v633_v13 = vld [vmem:[%s456_s14] sm:$0xff]  ;;  %s1477_s29 = sshll.u32 %s1650_s15, 3  ;;  %s1670_s13 = sadd.s32 4294967295, %s1314_s16  }
  0x29   : > { %1060 = vmatpush3.bf16.msra.mxu0 %v1059_v5  ;;  %v634_v14 = vld [vmem:[%s456_s14 + $0x8] sm:$0xff]  ;;  %v1068_v15 = vpack.c.bf16 %v555_v12, %v554_v11  ;;  %v466_v16 = vld [vmem:[%s441_s17] sm:$0xff]  ;;  %v635_v18 = vld [vmem:[%s456_s14 + $0x10] sm:$0xff]  ;;  %s1490_s1 = sand.u32 1, %s1670_s13   ;;  %s430_s20 = scalar_lea.vmem [#allocation4], %s1477_s29 }
  0x2a   : > { %1061 = vmatprep.subr.bf16.mxu0 %v1316_v0  ;;  %1066 = vmatpush3.bf16.msra.mxu1 %v1065_v9  ;;  %v1071_v17 = vpack.c.bf16 %v634_v14, %v633_v13  ;;  %v636_v19 = vld [vmem:[%s456_s14 + $0x18] sm:$0xff]  ;;  %s741_s14 = sadd.s32 %s1298_s12, %s999_s18  ;;  %v990_v21 = vld [vmem:[%s459_s27] ss:$0 sm:$0xff]  ;;  %s760_s15 = sshll.u32 %s430_s20, 4  ;;  %s1504_s15 = int_to_ptr.vmem [resolvable:$true] %s760_s15 }
  0x2b   : > { %1067 = vmatprep.subr.bf16.mxu1 %v1316_v0  ;;  %v1074_v20 = vpack.c.bf16 %v636_v19, %v635_v18  ;;  %s1492_s19 = sshll.u32 %s741_s14, 7  ;;  %s1651_s12 = scalar_lea.vmem [#allocation2], %s1477_s29 }
  0x2c   : > { %s745_s18 = sshll.u32 %s1651_s12, 4  ;;  %s1502_s14 = scalar_lea.hbm %s1642_s8, %s1492_s19  ;;  %s1512_s18 = int_to_ptr.vmem [resolvable:$true] %s745_s18 }
  0x2d   : > { %1063 = vmatpush3.bf16.msra.mxu0 %v1062_v10  ;;  %s1510_s25 = scalar_lea.hbm %s1641_s7, %s1492_s19  ;;  %s1652_s17 = scalar_lea.vmem [#allocation6], %s1477_s29 }
  0x2e   : > { %1070 = vmatprep.subr.bf16.mxu0 %v1316_v0  ;;  %1069 = vmatpush3.bf16.msra.mxu1 %v1068_v15  ;;  %s1518_s13 = sshll.u32 %s1652_s17, 4  ;;  %s1160_s21 = scalar_lea.vmem %s1504_s15, 128  ;;  %s776_s13 = int_to_ptr.vmem [resolvable:$true] %s1518_s13 }
  0x2f   : > { %p1161_p0 = scmp.ne.s32.totalorder %s1504_s15, %s1160_s21  ;;  %s1319_s0 = smov [#allocation4]  }
  0x30   : > { %1034 = vmatmul.mubr.msk.f32.vlgmr.msra.gmra.mrb[0].mxu0 %vm478_vm1, %v466_v16  ;;  %s1164_s12 = sshll.u32 %s1319_s0, 4  ;;  %s1165_s12 = int_to_ptr.vmem [resolvable:$false] %s1164_s12 }
  0x31   : > { %1072 = vmatpush3.bf16.msra.mxu0 %v1071_v17  ;;  %1045 = vmatmul.mubr.msk.f32.vlgmr.msra.gmra.mrb[0].mxu1 %vm478_vm1, %v466_v16  ;;  %p1162_p1 = pnand %p1161_p0, %p1425_p3  ;;  %s1166_s26 = scalar_lea.vmem %s1165_s12, 256 }
  0x32   : > { %1073 = vmatprep.subr.bf16.mxu0 %v1316_v0  ;;  %1055 = vmatprep.mubr.msk.f32.mxu0 %vm1317_vm0, %v1318_v1  ;;  %p1167_p4 = scmp.lt.s32.totalorder %s1504_s15, %s1165_s12  ;;  %p1168_p5 = scmp.lt.s32.totalorder %s1166_s26, %s1160_s21 }
  0x33   : > { %p1163_p2 = pneg %p1162_p1 }
  0x34   : > { %p1169_p6 = por %p1168_p5, %p1167_p4 }
  0x35   : > { %1075 = vmatpush3.bf16.msra.mxu0 %v1074_v20 }
  0x36   : > { %p1170_p7 = pnand %p1169_p6, %p1163_p2 }
  0x38   : > { %1056 = vmatmul.mubr.msk.f32.vlgmr.msra.gmra.mrb[2].mxu0 %vm478_vm1, %v466_v16 }
 0x103   : > { %v548_v23 = vpop.f32.mrb[0].mxu0 }
 0x104   : > { %v549_v24 = vadd.f32 %v990_v21, %v548_v23  ;;  %v1035_v25 = vpop.f32.mrb[1].mxu0  ;;  %v629_v26 = vpop.f32.mrb[0].mxu1 }
 0x105   : > { %v630_v27 = vadd.f32 %v992_v22, %v629_v26  ;;  %v1046_v28 = vpop.f32.mrb[1].mxu1 }
 0x106   : > { %v714_v29 = vmul.f32 0.35355338, %v549_v24 }
 0x107   : > { %717 = vst.msk [vmem:[%s430_s20] sm:$0xff] %vm715_vm2, %v630_v27 }
 0x108   : > { %1173 = shalt.err (!%p1170_p7)
}
 0x109   : > { %s1174_s20 = scalar_lea.hbm %s1502_s14, 128  ;;  %s1178_s0 = scalar_lea.hbm %s1642_s8, 1024 }
 0x10a   : > { %p1175_p9 = scmp.ne.s32.totalorder %s1502_s14, %s1174_s20  ;;  %p1179_p12 = scmp.lt.u32.totalorder %s1502_s14, %s1642_s8 }
 0x10b   : > { %p1180_p13 = scmp.lt.u32.totalorder %s1178_s0, %s1174_s20  ;;  %p1182_p1 = scmp.lt.u32.totalorder %s1174_s20, %s1502_s14 }
 0x10c   : > { %p1176_p10 = pnand %p1175_p9, %p1425_p3 }
 0x10d   : > { %p1181_p0 = por %p1180_p13, %p1179_p12 }
 0x10e   : > { %p1177_p11 = pneg %p1176_p10 }
 0x10f   : > { %p1183_p2 = por %p1182_p1, %p1181_p0 }
 0x111   : > { %p1184_p4 = pnand %p1183_p2, %p1177_p11 }
 0x113   : > { %1187 = shalt.err (!%p1184_p4)
}
 0x114   : > { %s1671_s21 = scalar_lea.sflag [#allocation5], %s1490_s1  ;;  %s1672_s17 = scalar_lea.vmem [#allocation2], %s1477_s29 }
 0x115   : > { %1077 = dma.vmem_to_hbm [thread:$0]  (%p1425_p3), %s1504_s15, 128, %s1502_s14, %s1671_s21   ;;  %716 = vst.msk [vmem:[%s1672_s17] sm:$0xff] %vm715_vm2, %v714_v29 }
 0x116   : > { %s1673_s20 = scalar_lea.vmem %s1640_s6, %s1450_s28  ;;  %s1674_s24 = sand.u32 1, %s1290_s10  }
 0x117   : > { %v994_v30 = vld [vmem:[%s1673_s20] ss:$0 sm:$0xff]  ;;  %s720_s0 = scalar_lea.sflag [#allocation3], %s1674_s24  ;;  %s1188_s12 = scalar_lea.vmem %s1512_s18, 128 }
 0x118   : > { %p1189_p5 = scmp.ne.s32.totalorder %s1512_s18, %s1188_s12  ;;  %s1320_s2 = smov [#allocation2]  }
 0x119   : > { %s1192_s3 = sshll.u32 %s1320_s2, 4  ;;  %s1193_s3 = int_to_ptr.vmem [resolvable:$false] %s1192_s3 }
 0x11a   : > { %p1190_p6 = pnand %p1189_p5, %p1425_p3  ;;  %s1194_s4 = scalar_lea.vmem %s1193_s3, 256 }
 0x11b   : > { %p1195_p9 = scmp.lt.s32.totalorder %s1512_s18, %s1193_s3  ;;  %p1196_p10 = scmp.lt.s32.totalorder %s1194_s4, %s1188_s12 }
 0x11c   : > { %p1191_p7 = pneg %p1190_p6 }
 0x11d   : > { %p1197_p11 = por %p1196_p10, %p1195_p9 }
 0x11f   : > { %p1198_p12 = pnand %p1197_p11, %p1191_p7 }
 0x121   : > { %1201 = shalt.err (!%p1198_p12)
}
 0x122   : > { %s1202_s28 = scalar_lea.hbm %s1510_s25, 128  ;;  %s1206_s2 = scalar_lea.hbm %s1641_s7, 1024 }
 0x123   : > { %p1203_p13 = scmp.ne.s32.totalorder %s1510_s25, %s1202_s28  ;;  %p1207_p2 = scmp.lt.u32.totalorder %s1510_s25, %s1641_s7 }
 0x124   : > { %p1208_p4 = scmp.lt.u32.totalorder %s1206_s2, %s1202_s28  ;;  %p1210_p6 = scmp.lt.u32.totalorder %s1202_s28, %s1510_s25 }
 0x125   : > { %p1204_p0 = pnand %p1203_p13, %p1425_p3 }
 0x126   : > { %p1209_p5 = por %p1208_p4, %p1207_p2 }
 0x127   : > { %p1205_p1 = pneg %p1204_p0 }
 0x128   : > { %p1211_p7 = por %p1210_p6, %p1209_p5 }
 0x12a   : > { %p1212_p9 = pnand %p1211_p7, %p1205_p1 }
 0x12c   : > { %1215 = shalt.err (!%p1212_p9)
}
 0x12d   : > { %1076 = dma.vmem_to_hbm [thread:$0]  (%p1425_p3), %s1512_s18, 128, %s1510_s25, %s720_s0   ;;  %v710_v31 = vpop.f32.mrb[2].mxu0 }
 0x12e   : > { %v711_v32 = vadd.f32 %v994_v30, %v710_v31  ;;  %v1057_v33 = vpop.f32.mrb[3].mxu0  ;;  %s1579_s27 = scalar_lea.hbm %s1643_s9, %s1492_s19  ;;  %s1675_s26 = scalar_lea.vmem [#allocation6], %s1477_s29 }
 0x12f   : > { %s1216_s20 = scalar_lea.vmem %s776_s13, 128  ;;  %s1321_s24 = smov [#allocation6]  }
 0x130   : > { %718 = vst.msk [vmem:[%s1675_s26] sm:$0xff] %vm715_vm2, %v711_v32  ;;  %p1217_p10 = scmp.ne.s32.totalorder %s776_s13, %s1216_s20  ;;  %s1220_s12 = sshll.u32 %s1321_s24, 4  ;;  %s1221_s12 = int_to_ptr.vmem [resolvable:$false] %s1220_s12 }
 0x131   : > { %s1222_s18 = scalar_lea.vmem %s1221_s12, 256  ;;  %p1223_p13 = scmp.lt.s32.totalorder %s776_s13, %s1221_s12 }
 0x132   : > { %p1218_p11 = pnand %p1217_p10, %p1425_p3  ;;  %p1224_p0 = scmp.lt.s32.totalorder %s1222_s18, %s1216_s20 }
 0x134   : > { %p1219_p12 = pneg %p1218_p11  ;;  %p1225_p1 = por %p1224_p0, %p1223_p13 }
 0x136   : > { %p1226_p2 = pnand %p1225_p1, %p1219_p12 }
 0x138   : > { %1229 = shalt.err (!%p1226_p2)
}
 0x139   : > { %s1230_s29 = scalar_lea.hbm %s1579_s27, 128  ;;  %s1234_s0 = scalar_lea.hbm %s1643_s9, 1024 }
 0x13a   : > { %p1231_p4 = scmp.ne.s32.totalorder %s1579_s27, %s1230_s29  ;;  %p1235_p7 = scmp.lt.u32.totalorder %s1579_s27, %s1643_s9 }
 0x13b   : > { %p1236_p9 = scmp.lt.u32.totalorder %s1234_s0, %s1230_s29  ;;  %p1238_p11 = scmp.lt.u32.totalorder %s1230_s29, %s1579_s27 }
 0x13c   : > { %p1232_p5 = pnand %p1231_p4, %p1425_p3 }
 0x13d   : > { %p1237_p10 = por %p1236_p9, %p1235_p7 }
 0x13e   : > { %p1233_p6 = pneg %p1232_p5 }
 0x13f   : > { %p1239_p12 = por %p1238_p11, %p1237_p10 }
 0x141   : > { %p1240_p13 = pnand %p1239_p12, %p1233_p6 }
 0x143   : > { %1243 = shalt.err (!%p1240_p13)
}
 0x144   : > { %s1676_s14 = scalar_lea.sflag [#allocation5], %s1490_s1 }
 0x145   : > { %1078 = dma.vmem_to_hbm [thread:$0]  (%p1425_p3), %s776_s13, 128, %s1579_s27, %s1676_s14  }
 0x146 PF: > { %p1092_p0 = scmp.ge.s32.totalorder %s1314_s16, 2  ;;  %s787_s2 = sand.u32 1, %s1286_s30  }
 0x147   : > { %s788_s21 = scalar_lea.sflag [#allocation3], %s787_s2 }
 0x148   : > { %p1083_p1 = pnand %p1092_p0, %p1436_p8 }
 0x14a   : > { %1277 = dma.done.wait (!%p1083_p1), %s788_s21, 128  }
 0x14b   : > { %1279 = vsyncadd (!%p1083_p1), %s788_s21, 4294967168  ;;  %s1677_s3 = sadd.s32 4294967294, %s1314_s16  }
 0x14c   : > { %s796_s4 = sand.u32 1, %s1677_s3  }
 0x14d   : > { %s797_s17 = scalar_lea.sflag [#allocation5], %s796_s4 }
 0x14e   : > { %1281 = dma.done.wait (!%p1083_p1), %s797_s17, 256  }
 0x14f   : > { %1283 = vsyncadd (!%p1083_p1), %s797_s17, 4294967040  ;;  %s26_s16 = sadd.s32 1, %s1314_s16   ;;  %s1678_s1 = sld [smem:[#allocation13_spill]] }
 0x150   : > { %p23_p3 = scmp.ge.s32.totalorder %s26_s16, 10   ;;  %s1679_s12 = sld [smem:[#allocation9_spill]] }
 0x151   : > { %s1680_s13 = sld [smem:[#allocation10_spill]]  ;;  %s1681_s14 = sld [smem:[#allocation11_spill]] }
 0x152   : > { %s1682_s15 = sld [smem:[#allocation12_spill]]  ;;  %s1683_s30 = smov %s1290_s10 }
 0x153   : > { %s1684_s10 = smov %s1294_s11  ;;  %25 = sbr.rel (!%p23_p3) target bundleno = 13 (0xd), region = 133 }
 0x155   : > { %s1685_s11 = smov %s1678_s1 }
 0x15a   :  { %811 = vsyncpa [#allocation3], 1 }
 0x15b   :  { %813 = vsyncpa [#allocation3 + $0x1], 1 }
 0x15c   :  { %814 = vsyncpa [#allocation5], 1 }
 0x15d   :  { %816 = vsyncpa [#allocation5 + $0x1], 1 }

</bundles_post_ra>
